<compile_context>
chip_gen: v5e
topology: v5e:2x2
jax: 0.10.0
libtpu: 0.0.40
codegen_flags: <defaults>
</compile_context>

<pallas_src>
import math

import jax
import jax.numpy as jnp
from jax.experimental import pallas as pl
from jax.experimental.pallas import tpu as pltpu


def _round_up(x, m):
    return (x + m - 1) // m * m


# ----------------------------- Pallas kernel ------------------------------ #
def diffusion_embedding_kernel(steps_ref, emb_ref, w1_ref, b1_ref, w2_ref, b2_ref, o_ref):
    """Fused: embedding gather (via one-hot matmul) + 2x (Linear + SiLU).

    steps_ref : (Bp, 1) int32   — diffusion step indices (rows padded w/ 0)
    emb_ref   : (Np, E) f32     — sinusoidal embedding table (rows padded w/ 0)
    w*_ref    : (in, out) f32   — pre-transposed Linear weights
    b*_ref    : (1, out) f32
    o_ref     : (Bp, P) f32
    """
    bp = steps_ref.shape[0]
    n = emb_ref.shape[0]

    # Gather as a one-hot matmul (regular MXU op instead of irregular row loads).
    steps = steps_ref[...]                                            # (Bp, 1) i32
    iota = jax.lax.broadcasted_iota(jnp.int32, (bp, n), 1)            # (Bp, Np)
    one_hot = (steps == iota).astype(jnp.float32)                     # (Bp, Np)
    x = jnp.dot(one_hot, emb_ref[...], preferred_element_type=jnp.float32)  # (Bp, E)

    # projection1 + SiLU (activation math kept in f32 — VPU fast path on all gens)
    h = jnp.dot(x, w1_ref[...], preferred_element_type=jnp.float32) + b1_ref[...]
    h = h * jax.nn.sigmoid(h)
    # projection2 + SiLU
    y = jnp.dot(h, w2_ref[...], preferred_element_type=jnp.float32) + b2_ref[...]
    y = y * jax.nn.sigmoid(y)

    o_ref[...] = y.astype(o_ref.dtype)


def diffusion_embedding_pallas(steps_i32, emb_pad, w1_t, b1, w2_t, b2):
    """Single grid-less pallas_call; everything resident in VMEM.

    steps_i32: (Bp, 1) int32 with Bp a multiple of 8.
    emb_pad  : (Np, E) f32 with Np a multiple of 8.
    """
    bp = steps_i32.shape[0]
    p = w2_t.shape[1]
    return pl.pallas_call(
        diffusion_embedding_kernel,
        out_shape=jax.ShapeDtypeStruct((bp, p), jnp.float32),
        in_specs=[pl.BlockSpec(memory_space=pltpu.MemorySpace.VMEM)] * 6,
        out_specs=pl.BlockSpec(memory_space=pltpu.MemorySpace.VMEM),
    )(steps_i32, emb_pad, w1_t, b1, w2_t, b2)


# ------------------------- Forward-path wrappers --------------------------- #
def pad_embedding(embedding):
    """Pad the embedding table rows to a multiple of 8 sublanes (zeros)."""
    n, e = embedding.shape
    n_pad = _round_up(n, 8)
    return jnp.pad(embedding, ((0, n_pad - n), (0, 0)))


def precompute_output_table(embedding, w1_t, b1, w2_t, b2):
    """Highest-value optimization: run the kernel ONCE over all num_steps rows.

    The module output depends only on diffusion_step and frozen parameters, so
    the whole (num_steps, P) result is computed in a single Pallas call at init
    and runtime forward becomes a pure gather (no dispatch / weight DMA)."""
    num_steps = embedding.shape[0]
    emb_pad = pad_embedding(embedding)
    n_pad = emb_pad.shape[0]
    steps = jnp.arange(n_pad, dtype=jnp.int32)[:, None]               # (Np, 1)
    table = diffusion_embedding_pallas(steps, emb_pad, w1_t, b1, w2_t, b2)
    return table[:num_steps]                                          # (N, P)


def diffusion_embedding_forward(diffusion_step, out_table):
    """Runtime path when the table has been precomputed: just a gather."""
    return out_table[diffusion_step]


def diffusion_embedding_forward_fused(diffusion_step, emb_pad, w1_t, b1, w2_t, b2):
    """Runtime path if on-the-fly evaluation is required: one fused Pallas call
    (gather + both Linear+SiLU), batch padded to a multiple of 8 sublanes."""
    b = diffusion_step.shape[0]
    b_pad = _round_up(max(b, 8), 8)
    steps = jnp.zeros((b_pad,), jnp.int32).at[:b].set(diffusion_step.astype(jnp.int32))
    out = diffusion_embedding_pallas(steps[:, None], emb_pad, w1_t, b1, w2_t, b2)
    return out[:b]


# ----------------------------- Module "setup" ----------------------------- #
def build_embedding_table(num_steps, half_dim):
    """Matches DiffusionEmbedding._build_embedding."""
    steps = jnp.arange(num_steps, dtype=jnp.float32)[:, None]                 # (N, 1)
    freqs = 10.0 ** (jnp.arange(half_dim, dtype=jnp.float32)
                     / (half_dim - 1) * 4.0)[None, :]                          # (1, D/2)
    table = steps * freqs                                                      # (N, D/2)
    return jnp.concatenate([jnp.sin(table), jnp.cos(table)], axis=1)           # (N, D)


def init_linear(key, in_dim, out_dim):
    """Deterministic init mimicking nn.Linear (uniform +-1/sqrt(in_dim)).

    Returns weight already transposed to (in, out) and bias as (1, out)."""
    kw, kb = jax.random.split(key)
    bound = 1.0 / math.sqrt(in_dim)
    w = jax.random.uniform(kw, (out_dim, in_dim), jnp.float32, -bound, bound)
    b = jax.random.uniform(kb, (out_dim,), jnp.float32, -bound, bound)
    return w.T, b[None, :]


# ------------------------------ Reference ---------------------------------- #
def diffusion_embedding_ref(diffusion_step, embedding, w1_t, b1, w2_t, b2):
    x = embedding[diffusion_step]
    x = x @ w1_t + b1
    x = x * jax.nn.sigmoid(x)
    x = x @ w2_t + b2
    x = x * jax.nn.sigmoid(x)
    return x


if __name__ == "__main__":
    num_steps = 50
    embedding_dim = 128       # module default
    projection_dim = 128      # module default (= embedding_dim)
    B = 8                     # batch of diffusion steps

    key = jax.random.PRNGKey(0)
    k_step, k_l1, k_l2 = jax.random.split(key, 3)

    # buffer + parameters (deterministic, in-script)
    embedding = build_embedding_table(num_steps, embedding_dim // 2)   # (50, 128)
    w1_t, b1 = init_linear(k_l1, embedding_dim, projection_dim)        # (128,128),(1,128)
    w2_t, b2 = init_linear(k_l2, projection_dim, projection_dim)       # (128,128),(1,128)

    diffusion_step = jax.random.randint(k_step, (B,), 0, num_steps)    # int32 (8,)

    # --- Path 1 (recommended): precompute full output table with ONE kernel call,
    #     then runtime forward is a pure gather.
    out_table = jax.block_until_ready(
        precompute_output_table(embedding, w1_t, b1, w2_t, b2))        # (50, 128)
    out_precomp = jax.block_until_ready(
        diffusion_embedding_forward(diffusion_step, out_table))        # (8, 128)

    # --- Path 2: fully fused runtime kernel (gather + 2x Linear+SiLU in one call).
    emb_pad = pad_embedding(embedding)                                 # (56, 128)
    out_fused = jax.block_until_ready(
        diffusion_embedding_forward_fused(diffusion_step, emb_pad,
                                          w1_t, b1, w2_t, b2))         # (8, 128)

    ref = diffusion_embedding_ref(diffusion_step, embedding, w1_t, b1, w2_t, b2)
    assert out_precomp.shape == (B, projection_dim)
    assert out_fused.shape == (B, projection_dim)
    assert jnp.allclose(out_precomp, ref, atol=1e-5, rtol=1e-5), "precomputed path mismatch"
    assert jnp.allclose(out_fused, ref, atol=1e-5, rtol=1e-5), "fused path mismatch"

    print("KERNEL_OK")
</pallas_src>

<mosaic_0001>
module attributes {stable_mosaic.version = 11 : i64} {
  func.func @diffusion_embedding_kernel(%arg0: memref<56x1xi32, #tpu.memory_space<vmem>>, %arg1: memref<56x128xf32, #tpu.memory_space<vmem>>, %arg2: memref<128x128xf32, #tpu.memory_space<vmem>>, %arg3: memref<1x128xf32, #tpu.memory_space<vmem>>, %arg4: memref<128x128xf32, #tpu.memory_space<vmem>>, %arg5: memref<1x128xf32, #tpu.memory_space<vmem>>, %arg6: memref<56x128xf32, #tpu.memory_space<vmem>>) attributes {dimension_semantics = [], scalar_prefetch = 0 : i64, scratch_operands = 0 : i64, tpu.core_type = #tpu.core_type<tc>} {
    %c0 = arith.constant 0 : index
    %c0_0 = arith.constant 0 : index
    %0 = vector.load %arg0[%c0, %c0_0] : memref<56x1xi32, #tpu.memory_space<vmem>>, vector<56x1xi32>
    %1 = tpu.iota {dimensions = array<i32: 1>} : vector<56x56xi32>
    %2 = vector.broadcast %0 : vector<56x1xi32> to vector<56x56xi32>
    %3 = arith.cmpi eq, %2, %1 : vector<56x56xi32>
    %4 = arith.extui %3 : vector<56x56xi1> to vector<56x56xi32>
    %5 = arith.sitofp %4 : vector<56x56xi32> to vector<56x56xf32>
    %c0_1 = arith.constant 0 : index
    %c0_2 = arith.constant 0 : index
    %6 = vector.load %arg1[%c0_1, %c0_2] : memref<56x128xf32, #tpu.memory_space<vmem>>, vector<56x128xf32>
    %cst = arith.constant dense<0.000000e+00> : vector<56x128xf32>
    %7 = tpu.matmul %5, %6, %cst {dimension_numbers = #tpu.dot_dimension_numbers<[1], [0], [0], [1], [0, 0, 1, 1], [], []>} : vector<56x56xf32>, vector<56x128xf32>, vector<56x128xf32> -> vector<56x128xf32>
    %c0_3 = arith.constant 0 : index
    %c0_4 = arith.constant 0 : index
    %8 = vector.load %arg2[%c0_3, %c0_4] : memref<128x128xf32, #tpu.memory_space<vmem>>, vector<128x128xf32>
    %cst_5 = arith.constant dense<0.000000e+00> : vector<56x128xf32>
    %9 = tpu.matmul %7, %8, %cst_5 {dimension_numbers = #tpu.dot_dimension_numbers<[1], [0], [0], [1], [0, 0, 1, 1], [], []>} : vector<56x128xf32>, vector<128x128xf32>, vector<56x128xf32> -> vector<56x128xf32>
    %c0_6 = arith.constant 0 : index
    %c0_7 = arith.constant 0 : index
    %10 = vector.load %arg3[%c0_6, %c0_7] : memref<1x128xf32, #tpu.memory_space<vmem>>, vector<1x128xf32>
    %11 = vector.broadcast %10 : vector<1x128xf32> to vector<56x128xf32>
    %12 = arith.addf %9, %11 : vector<56x128xf32>
    %13 = arith.negf %12 : vector<56x128xf32>
    %14 = math.exp %13 : vector<56x128xf32>
    %cst_8 = arith.constant 1.000000e+00 : f32
    %15 = vector.broadcast %cst_8 : f32 to vector<56x128xf32>
    %16 = arith.addf %15, %14 : vector<56x128xf32>
    %17 = arith.divf %15, %16 : vector<56x128xf32>
    %18 = arith.mulf %12, %17 : vector<56x128xf32>
    %c0_9 = arith.constant 0 : index
    %c0_10 = arith.constant 0 : index
    %19 = vector.load %arg4[%c0_9, %c0_10] : memref<128x128xf32, #tpu.memory_space<vmem>>, vector<128x128xf32>
    %cst_11 = arith.constant dense<0.000000e+00> : vector<56x128xf32>
    %20 = tpu.matmul %18, %19, %cst_11 {dimension_numbers = #tpu.dot_dimension_numbers<[1], [0], [0], [1], [0, 0, 1, 1], [], []>} : vector<56x128xf32>, vector<128x128xf32>, vector<56x128xf32> -> vector<56x128xf32>
    %c0_12 = arith.constant 0 : index
    %c0_13 = arith.constant 0 : index
    %21 = vector.load %arg5[%c0_12, %c0_13] : memref<1x128xf32, #tpu.memory_space<vmem>>, vector<1x128xf32>
    %22 = vector.broadcast %21 : vector<1x128xf32> to vector<56x128xf32>
    %23 = arith.addf %20, %22 : vector<56x128xf32>
    %24 = arith.negf %23 : vector<56x128xf32>
    %25 = math.exp %24 : vector<56x128xf32>
    %cst_14 = arith.constant 1.000000e+00 : f32
    %26 = vector.broadcast %cst_14 : f32 to vector<56x128xf32>
    %27 = arith.addf %26, %25 : vector<56x128xf32>
    %28 = arith.divf %26, %27 : vector<56x128xf32>
    %29 = arith.mulf %23, %28 : vector<56x128xf32>
    %c0_15 = arith.constant 0 : index
    %c0_16 = arith.constant 0 : index
    %30 = vector.load %arg6[%c0_15, %c0_16] : memref<56x128xf32, #tpu.memory_space<vmem>>, vector<56x128xf32>
    tpu.vector_store %arg6[%c0_15, %c0_16], %29 {strides = array<i32>} : memref<56x128xf32, #tpu.memory_space<vmem>>, vector<56x128xf32>,
    return
  }
}

</mosaic_0001>

<bundles_post_ra>
// kernel: tpu_custom_call.1
= control target key start
LH: loop header
LB: loop body
LE: loop exit
PB: predicated region body
PF: predicated region fallthrough
CT: control target
= control target key end

     0   :  { %11 = vsyncpa [#allocation3], 0  ;;  %s976_s0 = inlined_call_operand.vmem [shape: s32[56,1], index: 0, kind: input, shape index: {}]   ;;  %s977_s1 = inlined_call_operand.vmem [shape: f32[56,128], index: 1, kind: input, shape index: {}]   ;;  %s978_s2 = inlined_call_operand.hbm [shape: f32[128,128], index: 2, kind: input, shape index: {}]   ;;  %s979_s3 = inlined_call_operand.vmem [shape: f32[1,128], index: 3, kind: input, shape index: {}]   ;;  %s980_s4 = inlined_call_operand.hbm [shape: f32[128,128], index: 4, kind: input, shape index: {}]   ;;  %s981_s5 = inlined_call_operand.vmem [shape: f32[1,128], index: 5, kind: input, shape index: {}]   ;;  %s982_s6 = inlined_call_operand.hbm [shape: f32[56,128], index: 6, kind: output, shape index: {}]  }
   0x1   :  { %12 = vsyncpa [#allocation6], 0 }
   0x2   :  { %13 = vsyncpa [#allocation4], 0  ;;  %s22_s23 = sshll.u32 %s978_s2, 4  ;;  %s803_s24 = smov [#allocation2]   ;;  %s23_s23 = int_to_ptr.hbm [resolvable:$true] %s22_s23 }
   0x3   :  { %s24_s25 = sshll.u32 %s803_s24, 4  ;;  %s37_s28 = sshll.u32 %s980_s4, 4  ;;  %s25_s25 = int_to_ptr.vmem [resolvable:$true] %s24_s25  ;;  %s38_s28 = int_to_ptr.hbm [resolvable:$true] %s37_s28 }
   0x4   :  { %s804_s29 = smov 128   ;;  %s805_s30 = smov 8  }
   0x5   :  { %30 = dma.hbm_to_vmem [thread:$0]  %s23_s23, 2048, %s25_s25, [#allocation3], %s804_s29, %s804_s29, %s805_s30  }
   0x6   :  { %s806_s7 = smov [#allocation5]  }
   0x7   :  { %s39_s8 = sshll.u32 %s806_s7, 4  ;;  %s40_s8 = int_to_ptr.vmem [resolvable:$true] %s39_s8 }
   0x8   :  { %45 = dma.hbm_to_vmem [thread:$0]  %s38_s28, 2048, %s40_s8, [#allocation6], %s804_s29, %s804_s29, %s805_s30  }
   0x9   :  { %797 = dma.done.wait [#allocation3], 2048  }
   0xa   :  { %798 = vsyncadd [#allocation3], 4294965248 }
   0xb   :  { %799 = dma.done.wait [#allocation6], 2048  }
   0xc   :  { %800 = vsyncadd [#allocation6], 4294965248  ;;  %v807_v0 = vmov 0   ;;  %v56_v1 = vld [vmem:[%s976_s0] sm:$0xff]  ;;  %v58_v2 = vld [vmem:[%s976_s0 + $0x10] sm:$0xff]  ;;  %v63_v15 = vlaneseq  ;;  %vm114_vm0 = vcmask 457728  }
   0xd   :  { %664 = vset.pattern.permute.xlu0 %v807_v0  ;;  %665 = vset.pattern.permute.xlu1 %v807_v0  ;;  %v60_v3 = vld [vmem:[%s976_s0 + $0x20] sm:$0xff]  ;;  %v113_v4 = vld [vmem:[%s977_s1 + $0x30] sm:$0xff]  ;;  %v112_v5 = vld [vmem:[%s977_s1 + $0x28] sm:$0xff]  ;;  %v808_v18 = vmov 0.0   ;;  %s583_s15 = sshll.u32 %s982_s6, 4  ;;  %s584_s15 = int_to_ptr.hbm [resolvable:$true] %s583_s15 }
   0xe   :  { %666 = vset.pattern.permute.xlu2 %v807_v0  ;;  %66 = vperm.xlu0 %664, %v56_v1   ;;  %v111_v6 = vld [vmem:[%s977_s1 + $0x20] sm:$0xff]  ;;  %v57_v7 = vld [vmem:[%s976_s0 + $0x8] sm:$0xff]  ;;  %v59_v8 = vld [vmem:[%s976_s0 + $0x18] sm:$0xff]  ;;  %v899_v16 = vand.u32 127, %v63_v15 }
   0xf   :  { %72 = vperm.xlu1 %665, %v58_v2   ;;  %78 = vperm.xlu2 %666, %v60_v3   ;;  %v61_v9 = vld [vmem:[%s976_s0 + $0x28] sm:$0xff]  ;;  %v110_v10 = vld [vmem:[%s977_s1 + $0x18] sm:$0xff]  ;;  %v109_v11 = vld [vmem:[%s977_s1 + $0x10] sm:$0xff] }
  0x10   :  { %145 = vmatpush.msra.mxu0 %v113_v4  ;;  %v108_v12 = vld [vmem:[%s977_s1 + $0x8] sm:$0xff]  ;;  %v62_v13 = vld [vmem:[%s976_s0 + $0x30] sm:$0xff]  ;;  %v107_v14 = vld [vmem:[%s977_s1] sm:$0xff] }
  0x11   :  { %v189_v24 = vld [vmem:[#allocation2 + $0x78] sm:$0xff]  ;;  %v188_v25 = vld [vmem:[#allocation2 + $0x70] sm:$0xff]  ;;  %v187_v27 = vld [vmem:[#allocation2 + $0x68] sm:$0xff] }
  0x12   :  { %146 = vmatpush.msra.mxu0 %v112_v5  ;;  %194 = vmatpush.msra.mxu1 %v189_v24  ;;  %v186_v28 = vld [vmem:[#allocation2 + $0x60] sm:$0xff]  ;;  %v185_v29 = vld [vmem:[#allocation2 + $0x58] sm:$0xff]  ;;  %v184_v32 = vld [vmem:[#allocation2 + $0x50] sm:$0xff] }
  0x13   :  { %625 = vmatpush.msra.mxu3 %v189_v24  ;;  %v183_v33 = vld [vmem:[#allocation2 + $0x48] sm:$0xff]  ;;  %v182_v34 = vld [vmem:[#allocation2 + $0x40] sm:$0xff]  ;;  %v181_v36 = vld [vmem:[#allocation2 + $0x38] sm:$0xff] }
  0x14   :  { %147 = vmatpush.msra.mxu0 %v111_v6  ;;  %195 = vmatpush.msra.mxu1 %v188_v25  ;;  %v180_v37 = vld [vmem:[#allocation2 + $0x30] sm:$0xff]  ;;  %v179_v39 = vld [vmem:[#allocation2 + $0x28] sm:$0xff]  ;;  %v178_v40 = vld [vmem:[#allocation2 + $0x20] sm:$0xff] }
  0x15   :  { %626 = vmatpush.msra.mxu3 %v188_v25  ;;  %v177_v41 = vld [vmem:[#allocation2 + $0x18] sm:$0xff]  ;;  %v176_v43 = vld [vmem:[#allocation2 + $0x10] sm:$0xff]  ;;  %v175_v45 = vld [vmem:[#allocation2 + $0x8] sm:$0xff] }
  0x16   :  { %69 = vperm.xlu0 %664, %v57_v7   ;;  %148 = vmatpush.msra.mxu0 %v110_v10  ;;  %v174_v47 = vld [vmem:[#allocation2] sm:$0xff]  ;;  %v387_v55 = vld [vmem:[#allocation5 + $0x78] sm:$0xff]  ;;  %v386_v56 = vld [vmem:[#allocation5 + $0x70] sm:$0xff] }
  0x17   :  { %75 = vperm.xlu1 %665, %v59_v8   ;;  %81 = vperm.xlu2 %666, %v61_v9   ;;  %v385_v57 = vld [vmem:[#allocation5 + $0x68] sm:$0xff]  ;;  %v384_v58 = vld [vmem:[#allocation5 + $0x60] sm:$0xff]  ;;  %v383_v59 = vld [vmem:[#allocation5 + $0x58] sm:$0xff] }
  0x18   :  { %149 = vmatpush.msra.mxu0 %v109_v11  ;;  %196 = vmatpush.msra.mxu1 %v187_v27  ;;  %v382_v60 = vld [vmem:[#allocation5 + $0x50] sm:$0xff]  ;;  %v381_v61 = vld [vmem:[#allocation5 + $0x48] sm:$0xff]  ;;  %v380_v62 = vld [vmem:[#allocation5 + $0x40] sm:$0xff] }
  0x19   :  { %627 = vmatpush.msra.mxu3 %v187_v27  ;;  %392 = vmatpush.msra.mxu2 %v387_v55  ;;  %v379_v63 = vld [vmem:[#allocation5 + $0x38] sm:$0xff]  ;;  %v378_v0 = vld [vmem:[#allocation5 + $0x30] sm:$0xff]  ;;  %v377_v1 = vld [vmem:[#allocation5 + $0x28] sm:$0xff] }
  0x1a   :  { %150 = vmatpush.msra.mxu0 %v108_v12  ;;  %197 = vmatpush.msra.mxu1 %v186_v28  ;;  %v376_v2 = vld [vmem:[#allocation5 + $0x20] sm:$0xff]  ;;  %v375_v3 = vld [vmem:[#allocation5 + $0x18] sm:$0xff]  ;;  %v374_v4 = vld [vmem:[#allocation5 + $0x10] sm:$0xff] }
  0x1b   :  { %628 = vmatpush.msra.mxu3 %v186_v28  ;;  %393 = vmatpush.msra.mxu2 %v386_v56  ;;  %v925_v5 = vld [vmem:[%s979_s3] ss:$0 sm:$0xff]  ;;  %v373_v6 = vld [vmem:[#allocation5 + $0x8] sm:$0xff] }
  0x1c   :  { %151 = vmatpush.msra.mxu0 %v107_v14  ;;  %198 = vmatpush.msra.mxu1 %v185_v29  ;;  %v372_v7 = vld [vmem:[#allocation5] sm:$0xff] }
  0x1d   :  { %629 = vmatpush.msra.mxu3 %v185_v29  ;;  %394 = vmatpush.msra.mxu2 %v385_v57 }
  0x1e   :  { %84 = vperm.xlu0 %664, %v62_v13   ;;  %199 = vmatpush.msra.mxu1 %v184_v32 }
  0x1f   :  { %630 = vmatpush.msra.mxu3 %v184_v32  ;;  %395 = vmatpush.msra.mxu2 %v384_v58 }
  0x20   :  { %200 = vmatpush.msra.mxu1 %v183_v33 }
  0x21   :  { %631 = vmatpush.msra.mxu3 %v183_v33  ;;  %396 = vmatpush.msra.mxu2 %v383_v59 }
  0x22   :  { %201 = vmatpush.msra.mxu1 %v182_v34 }
  0x23   :  { %632 = vmatpush.msra.mxu3 %v182_v34  ;;  %397 = vmatpush.msra.mxu2 %v382_v60 }
  0x24   :  { %202 = vmatpush.msra.mxu1 %v181_v36 }
  0x25   :  { %633 = vmatpush.msra.mxu3 %v181_v36  ;;  %398 = vmatpush.msra.mxu2 %v381_v61 }
  0x26   :  { %203 = vmatpush.msra.mxu1 %v180_v37 }
  0x27   :  { %634 = vmatpush.msra.mxu3 %v180_v37  ;;  %399 = vmatpush.msra.mxu2 %v380_v62 }
  0x28   :  { %204 = vmatpush.msra.mxu1 %v179_v39 }
  0x29   :  { %635 = vmatpush.msra.mxu3 %v179_v39  ;;  %400 = vmatpush.msra.mxu2 %v379_v63 }
  0x2a   :  { %205 = vmatpush.msra.mxu1 %v178_v40 }
  0x2b   :  { %636 = vmatpush.msra.mxu3 %v178_v40  ;;  %401 = vmatpush.msra.mxu2 %v378_v0 }
  0x2c   :  { %206 = vmatpush.msra.mxu1 %v177_v41 }
  0x2d   :  { %637 = vmatpush.msra.mxu3 %v177_v41  ;;  %402 = vmatpush.msra.mxu2 %v377_v1 }
  0x2e   :  { %207 = vmatpush.msra.mxu1 %v176_v43 }
  0x2f   :  { %638 = vmatpush.msra.mxu3 %v176_v43  ;;  %403 = vmatpush.msra.mxu2 %v376_v2 }
  0x30   :  { %208 = vmatpush.msra.mxu1 %v175_v45 }
  0x31   :  { %639 = vmatpush.msra.mxu3 %v175_v45  ;;  %404 = vmatpush.msra.mxu2 %v375_v3 }
  0x32   :  { %209 = vmatpush.msra.mxu1 %v174_v47 }
  0x33   :  { %640 = vmatpush.msra.mxu3 %v174_v47  ;;  %405 = vmatpush.msra.mxu2 %v374_v4 }
  0x35   :  { %641 = vmatpush.msrb.mxu3 %v387_v55  ;;  %406 = vmatpush.msra.mxu2 %v373_v6 }
  0x37   :  { %642 = vmatpush.msrb.mxu3 %v386_v56  ;;  %407 = vmatpush.msra.mxu2 %v372_v7 }
  0x39   :  { %643 = vmatpush.msrb.mxu3 %v385_v57 }
  0x3b   :  { %644 = vmatpush.msrb.mxu3 %v384_v58 }
  0x3d   :  { %645 = vmatpush.msrb.mxu3 %v383_v59 }
  0x3f   :  { %646 = vmatpush.msrb.mxu3 %v382_v60 }
  0x41   :  { %647 = vmatpush.msrb.mxu3 %v381_v61 }
  0x43   :  { %648 = vmatpush.msrb.mxu3 %v380_v62 }
  0x45   :  { %649 = vmatpush.msrb.mxu3 %v379_v63 }
  0x47   :  { %650 = vmatpush.msrb.mxu3 %v378_v0 }
  0x49   :  { %651 = vmatpush.msrb.mxu3 %v377_v1 }
  0x4b   :  { %652 = vmatpush.msrb.mxu3 %v376_v2 }
  0x4d   :  { %653 = vmatpush.msrb.mxu3 %v375_v3 }
  0x4f   :  { %654 = vmatpush.msrb.mxu3 %v374_v4 }
  0x51   :  { %655 = vmatpush.msrb.mxu3 %v373_v6 }
  0x53   :  { %656 = vmatpush.msrb.mxu3 %v372_v7 }
  0x69   :  { %v79_v31 = vpop.permute.xlu2 %78 }
  0x6a   :  { %vm90_vm5 = vcmp.eq.s32.totalorder %v79_v31, %v899_v16 }
  0x6b   :  { %v601_v35 = vsel %vm90_vm5, 1.0, %v808_v18 }
  0x71   :  { %v82_v38 = vpop.permute.xlu2 %81 }
  0x72   :  { %vm91_vm6 = vcmp.eq.s32.totalorder %v82_v38, %v899_v16 }
  0x73   :  { %v602_v42 = vsel %vm91_vm6, 1.0, %v808_v18 }
  0x80   :  { %v67_v17 = vpop.permute.xlu0 %66 }
  0x81   :  { %vm86_vm1 = vcmp.eq.s32.totalorder %v67_v17, %v899_v16  ;;  %v73_v21 = vpop.permute.xlu1 %72 }
  0x82   :  { %v597_v19 = vsel %vm86_vm1, 1.0, %v808_v18  ;;  %vm88_vm3 = vcmp.eq.s32.totalorder %v73_v21, %v899_v16 }
  0x83   :  { %604 = vmatmul.msk.f32.vlgmr.msra.gmra.mxu0 %vm114_vm0, %v597_v19  ;;  %v599_v23 = vsel %vm88_vm3, 1.0, %v808_v18 }
  0x88   :  { %v70_v20 = vpop.permute.xlu0 %69 }
  0x89   :  { %vm87_vm2 = vcmp.eq.s32.totalorder %v70_v20, %v899_v16  ;;  %v76_v26 = vpop.permute.xlu1 %75 }
  0x8a   :  { %v598_v22 = vsel %vm87_vm2, 1.0, %v808_v18  ;;  %vm89_vm4 = vcmp.eq.s32.totalorder %v76_v26, %v899_v16 }
  0x8b   :  { %605 = vmatmul.msk.f32.gmra.mxu0 %vm114_vm0, %v598_v22  ;;  %v600_v30 = vsel %vm89_vm4, 1.0, %v808_v18 }
  0x90   :  { %v85_v44 = vpop.permute.xlu0 %84 }
  0x91   :  { %vm92_vm7 = vcmp.eq.s32.totalorder %v85_v44, %v899_v16 }
  0x92   :  { %v603_v46 = vsel %vm92_vm7, 1.0, %v808_v18 }
  0x93   :  { %606 = vmatmul.msk.f32.gmra.mxu0 %vm114_vm0, %v599_v23 }
  0x9b   :  { %607 = vmatmul.msk.f32.gmra.mxu0 %vm114_vm0, %v600_v30 }
  0xa3   :  { %608 = vmatmul.msk.f32.gmra.mxu0 %vm114_vm0, %v601_v35 }
  0xab   :  { %609 = vmatmul.msk.f32.gmra.mxu0 %vm114_vm0, %v602_v42 }
  0xb3   :  { %610 = vmatmul.msk.f32.gmra.mxu0 %vm114_vm0, %v603_v46 }
 0x100   :  { %v153_v48 = vpop.f32.mrf.mxu0 }
 0x101   :  { %210 = vmatmul.f32.vlgmr.msra.gmra.mxu1 %v153_v48 }
 0x108   :  { %v156_v49 = vpop.f32.mrf.mxu0 }
 0x109   :  { %213 = vmatmul.f32.gmra.mxu1 %v156_v49 }
 0x110   :  { %v159_v50 = vpop.f32.mrf.mxu0 }
 0x111   :  { %216 = vmatmul.f32.gmra.mxu1 %v159_v50 }
 0x118   :  { %v162_v51 = vpop.f32.mrf.mxu0 }
 0x119   :  { %219 = vmatmul.f32.gmra.mxu1 %v162_v51 }
 0x120   :  { %v165_v52 = vpop.f32.mrf.mxu0 }
 0x121   :  { %222 = vmatmul.f32.gmra.mxu1 %v165_v52 }
 0x128   :  { %v168_v53 = vpop.f32.mrf.mxu0 }
 0x129   :  { %225 = vmatmul.f32.vlgmr.msra.gmra.mxu3 %v168_v53 }
 0x130   :  { %v171_v54 = vpop.f32.mrf.mxu0 }
 0x131   :  { %228 = vmatmul.f32.gmra.mxu3 %v171_v54 }
 0x17e   :  { %v211_v8 = vpop.f32.mrf.mxu1 }
 0x17f   :  { %v212_v9 = vadd.f32 %v925_v5, %v211_v8 }
 0x181   :  { %v611_v10 = vmul.f32 -1.442695, %v212_v9 }
 0x183   :  { %669 = vpow2.f32 %v611_v10 }
 0x186   :  { %v214_v11 = vpop.f32.mrf.mxu1 }
 0x187   :  { %v215_v12 = vadd.f32 %v925_v5, %v214_v11 }
 0x189   :  { %v670_v13 = vpop.eup %669  ;;  %v612_v14 = vmul.f32 -1.442695, %v215_v12 }
 0x18a   :  { %v253_v15 = vadd.f32 1.0, %v670_v13 }
 0x18b   :  { %671 = vpow2.f32 %v612_v14 }
 0x18c   :  { %673 = vrcp.f32 %v253_v15  ;;  %v271_v25 = vand.u32 2147483648, %v253_v15  ;;  %v269_v28 = vand.u32 2147483647, %v253_v15  ;;  %vm265_vm9 = vweird.f32 %v253_v15 }
 0x18e   :  { %v217_v16 = vpop.f32.mrf.mxu1  ;;  %v272_v34 = vor.u32 1.1754944e-38, %v271_v25  ;;  %vm270_vm11 = vcmp.eq.f32.partialorder %v269_v28, 8.507059e+37 }
 0x18f   :  { %v930_v17 = vadd.f32 %v925_v5, %v217_v16 }
 0x191   :  { %v672_v18 = vpop.eup %671  ;;  %v613_v19 = vmul.f32 -1.442695, %v930_v17 }
 0x192   :  { %v674_v20 = vpop.eup %673  ;;  %v254_v21 = vadd.f32 1.0, %v672_v18 }
 0x193   :  { %675 = vpow2.f32 %v613_v19  ;;  %v261_v22 = vmul.f32 %v674_v20, %v253_v15  ;;  %vm266_vm8 = vweird.f32 %v674_v20 }
 0x194   :  { %677 = vrcp.f32 %v254_v21  ;;  %vm267_vm10 = vmor %vm265_vm9, %vm266_vm8  ;;  %v286_v41 = vand.u32 2147483648, %v254_v21  ;;  %v284_v44 = vand.u32 2147483647, %v254_v21  ;;  %vm280_vm13 = vweird.f32 %v254_v21 }
 0x195   :  { %v262_v23 = vsub.f32 1.0, %v261_v22 }
 0x196   :  { %v220_v24 = vpop.f32.mrf.mxu1  ;;  %v287_v50 = vor.u32 1.1754944e-38, %v286_v41  ;;  %vm285_vm15 = vcmp.eq.f32.partialorder %v284_v44, 8.507059e+37 }
 0x197   :  { %v934_v26 = vadd.f32 %v925_v5, %v220_v24  ;;  %v263_v27 = vmul.f32 %v674_v20, %v262_v23 }
 0x199   :  { %v676_v29 = vpop.eup %675  ;;  %v614_v30 = vmul.f32 -1.442695, %v934_v26  ;;  %v264_v31 = vadd.f32 %v674_v20, %v263_v27 }
 0x19a   :  { %v678_v32 = vpop.eup %677  ;;  %v255_v33 = vadd.f32 1.0, %v676_v29 }
 0x19b   :  { %679 = vpow2.f32 %v614_v30  ;;  %v268_v35 = vsel %vm267_vm10, %v674_v20, %v264_v31  ;;  %v276_v36 = vmul.f32 %v678_v32, %v254_v21  ;;  %vm281_vm12 = vweird.f32 %v678_v32 }
 0x19c   :  { %681 = vrcp.f32 %v255_v33  ;;  %v273_v37 = vsel %vm270_vm11, %v272_v34, %v268_v35  ;;  %vm282_vm14 = vmor %vm280_vm13, %vm281_vm12  ;;  %v301_v56 = vand.u32 2147483648, %v255_v33  ;;  %v299_v58 = vand.u32 2147483647, %v255_v33 }
 0x19d   :  { %v365_v38 = vmul.f32 %v273_v37, %v212_v9  ;;  %v277_v39 = vsub.f32 1.0, %v276_v36  ;;  %vm295_vm1 = vweird.f32 %v255_v33 }
 0x19e   :  { %v223_v40 = vpop.f32.mrf.mxu1  ;;  %v302_v63 = vor.u32 1.1754944e-38, %v301_v56  ;;  %vm300_vm3 = vcmp.eq.f32.partialorder %v299_v58, 8.507059e+37  ;;  %v949_v56 = vld [vmem:[%s981_s5] ss:$0 sm:$0xff]  ;;  %s809_s5 = smov [#allocation7]  }
 0x19f   :  { %v938_v42 = vadd.f32 %v925_v5, %v223_v40  ;;  %408 = vmatmul.f32.vlgmr.msra.gmra.mxu2 %v365_v38  ;;  %v278_v43 = vmul.f32 %v678_v32, %v277_v39  ;;  %s581_s12 = sshll.u32 %s809_s5, 4  ;;  %s582_s12 = int_to_ptr.vmem [resolvable:$true] %s581_s12 }
 0x1a1   :  { %v680_v45 = vpop.eup %679  ;;  %v615_v46 = vmul.f32 -1.442695, %v938_v42  ;;  %v279_v47 = vadd.f32 %v678_v32, %v278_v43 }
 0x1a2   :  { %v682_v48 = vpop.eup %681  ;;  %v256_v49 = vadd.f32 1.0, %v680_v45 }
 0x1a3   :  { %683 = vpow2.f32 %v615_v46  ;;  %v283_v51 = vsel %vm282_vm14, %v678_v32, %v279_v47  ;;  %v291_v52 = vmul.f32 %v682_v48, %v255_v33  ;;  %vm296_vm0 = vweird.f32 %v682_v48 }
 0x1a4   :  { %685 = vrcp.f32 %v256_v49  ;;  %v288_v53 = vsel %vm285_vm15, %v287_v50, %v283_v51  ;;  %vm297_vm2 = vmor %vm295_vm1, %vm296_vm0  ;;  %v316_v8 = vand.u32 2147483648, %v256_v49  ;;  %v314_v11 = vand.u32 2147483647, %v256_v49 }
 0x1a5   :  { %v366_v54 = vmul.f32 %v288_v53, %v215_v12  ;;  %v292_v55 = vsub.f32 1.0, %v291_v52  ;;  %vm310_vm5 = vweird.f32 %v256_v49 }
 0x1a6   :  { %v317_v14 = vor.u32 1.1754944e-38, %v316_v8  ;;  %vm315_vm7 = vcmp.eq.f32.partialorder %v314_v11, 8.507059e+37 }
 0x1a7   :  { %411 = vmatmul.f32.gmra.mxu2 %v366_v54  ;;  %v293_v57 = vmul.f32 %v682_v48, %v292_v55 }
 0x1a9   :  { %v684_v59 = vpop.eup %683  ;;  %v294_v60 = vadd.f32 %v682_v48, %v293_v57 }
 0x1aa   :  { %v686_v61 = vpop.eup %685  ;;  %v257_v62 = vadd.f32 1.0, %v684_v59 }
 0x1ab   :  { %v298_v0 = vsel %vm297_vm2, %v682_v48, %v294_v60  ;;  %v306_v1 = vmul.f32 %v686_v61, %v256_v49  ;;  %vm311_vm4 = vweird.f32 %v686_v61 }
 0x1ac   :  { %687 = vrcp.f32 %v257_v62  ;;  %v226_v2 = vpop.f32.mrf.mxu3  ;;  %v303_v3 = vsel %vm300_vm3, %v302_v63, %v298_v0  ;;  %vm312_vm6 = vmor %vm310_vm5, %vm311_vm4  ;;  %v331_v22 = vand.u32 2147483648, %v257_v62  ;;  %v329_v27 = vand.u32 2147483647, %v257_v62 }
 0x1ad   :  { %v227_v4 = vadd.f32 %v925_v5, %v226_v2  ;;  %v367_v6 = vmul.f32 %v303_v3, %v930_v17  ;;  %v307_v7 = vsub.f32 1.0, %v306_v1  ;;  %vm325_vm9 = vweird.f32 %v257_v62 }
 0x1ae   :  { %v332_v30 = vor.u32 1.1754944e-38, %v331_v22  ;;  %vm330_vm11 = vcmp.eq.f32.partialorder %v329_v27, 8.507059e+37 }
 0x1af   :  { %v616_v9 = vmul.f32 -1.442695, %v227_v4  ;;  %414 = vmatmul.f32.gmra.mxu2 %v367_v6  ;;  %v308_v10 = vmul.f32 %v686_v61, %v307_v7 }
 0x1b1   :  { %689 = vpow2.f32 %v616_v9  ;;  %v309_v12 = vadd.f32 %v686_v61, %v308_v10 }
 0x1b2   :  { %v688_v13 = vpop.eup %687 }
 0x1b3   :  { %v313_v15 = vsel %vm312_vm6, %v686_v61, %v309_v12  ;;  %v321_v16 = vmul.f32 %v688_v13, %v257_v62  ;;  %vm326_vm8 = vweird.f32 %v688_v13 }
 0x1b4   :  { %v229_v18 = vpop.f32.mrf.mxu3  ;;  %v318_v19 = vsel %vm315_vm7, %v317_v14, %v313_v15  ;;  %vm327_vm10 = vmor %vm325_vm9, %vm326_vm8 }
 0x1b5   :  { %v230_v17 = vadd.f32 %v925_v5, %v229_v18  ;;  %v368_v20 = vmul.f32 %v318_v19, %v934_v26  ;;  %v322_v21 = vsub.f32 1.0, %v321_v16 }
 0x1b7   :  { %v690_v23 = vpop.eup %689  ;;  %v617_v24 = vmul.f32 -1.442695, %v230_v17  ;;  %417 = vmatmul.f32.gmra.mxu2 %v368_v20  ;;  %v323_v25 = vmul.f32 %v688_v13, %v322_v21 }
 0x1b8   :  { %v258_v28 = vadd.f32 1.0, %v690_v23 }
 0x1b9   :  { %691 = vpow2.f32 %v617_v24  ;;  %v324_v29 = vadd.f32 %v688_v13, %v323_v25 }
 0x1ba   :  { %693 = vrcp.f32 %v258_v28  ;;  %v346_v37 = vand.u32 2147483648, %v258_v28  ;;  %v344_v39 = vand.u32 2147483647, %v258_v28  ;;  %vm340_vm13 = vweird.f32 %v258_v28 }
 0x1bb   :  { %v328_v31 = vsel %vm327_vm10, %v688_v13, %v324_v29 }
 0x1bc   :  { %v333_v5 = vsel %vm330_vm11, %v332_v30, %v328_v31  ;;  %v347_v43 = vor.u32 1.1754944e-38, %v346_v37  ;;  %vm345_vm15 = vcmp.eq.f32.partialorder %v344_v39, 8.507059e+37 }
 0x1bd   :  { %v369_v26 = vmul.f32 %v333_v5, %v938_v42 }
 0x1bf   :  { %v692_v32 = vpop.eup %691  ;;  %420 = vmatmul.f32.gmra.mxu2 %v369_v26 }
 0x1c0   :  { %v694_v33 = vpop.eup %693  ;;  %v259_v34 = vadd.f32 1.0, %v692_v32 }
 0x1c1   :  { %v336_v35 = vmul.f32 %v694_v33, %v258_v28  ;;  %vm341_vm12 = vweird.f32 %v694_v33 }
 0x1c2   :  { %695 = vrcp.f32 %v259_v34  ;;  %vm342_vm14 = vmor %vm340_vm13, %vm341_vm12  ;;  %v361_v48 = vand.u32 2147483648, %v259_v34  ;;  %v359_v50 = vand.u32 2147483647, %v259_v34  ;;  %vm355_vm1 = vweird.f32 %v259_v34 }
 0x1c3   :  { %v337_v36 = vsub.f32 1.0, %v336_v35 }
 0x1c4   :  { %v362_v52 = vor.u32 1.1754944e-38, %v361_v48  ;;  %vm360_vm3 = vcmp.eq.f32.partialorder %v359_v50, 8.507059e+37 }
 0x1c5   :  { %v338_v38 = vmul.f32 %v694_v33, %v337_v36 }
 0x1c7   :  { %v339_v40 = vadd.f32 %v694_v33, %v338_v38 }
 0x1c8   :  { %v696_v41 = vpop.eup %695 }
 0x1c9   :  { %v351_v44 = vmul.f32 %v696_v41, %v259_v34  ;;  %v343_v45 = vsel %vm342_vm14, %v694_v33, %v339_v40  ;;  %vm356_vm0 = vweird.f32 %v696_v41 }
 0x1ca   :  { %v348_v42 = vsel %vm345_vm15, %v347_v43, %v343_v45  ;;  %vm357_vm2 = vmor %vm355_vm1, %vm356_vm0 }
 0x1cb   :  { %v352_v46 = vsub.f32 1.0, %v351_v44  ;;  %v370_v47 = vmul.f32 %v348_v42, %v227_v4 }
 0x1cd   :  { %v353_v49 = vmul.f32 %v696_v41, %v352_v46  ;;  %423 = vmatmul.f32.gmra.mxu2 %v370_v47 }
 0x1cf   :  { %v354_v51 = vadd.f32 %v696_v41, %v353_v49 }
 0x1d1   :  { %v358_v53 = vsel %vm357_vm2, %v696_v41, %v354_v51 }
 0x1d2   :  { %v363_v54 = vsel %vm360_vm3, %v362_v52, %v358_v53 }
 0x1d3   :  { %v371_v55 = vmul.f32 %v363_v54, %v230_v17 }
 0x1d5   :  { %426 = vmatmul.f32.vlgmr.msrb.gmra.mxu3 %v371_v55 }
 0x222   :  { %v409_v57 = vpop.f32.mrf.mxu2 }
 0x223   :  { %v410_v58 = vadd.f32 %v949_v56, %v409_v57 }
 0x225   :  { %v618_v59 = vmul.f32 -1.442695, %v410_v58 }
 0x227   :  { %697 = vpow2.f32 %v618_v59 }
 0x22a   :  { %v412_v60 = vpop.f32.mrf.mxu2 }
 0x22b   :  { %v413_v61 = vadd.f32 %v949_v56, %v412_v60 }
 0x22d   :  { %v698_v62 = vpop.eup %697  ;;  %v619_v63 = vmul.f32 -1.442695, %v413_v61 }
 0x22e   :  { %v451_v0 = vadd.f32 1.0, %v698_v62 }
 0x22f   :  { %699 = vpow2.f32 %v619_v63 }
 0x230   :  { %701 = vrcp.f32 %v451_v0  ;;  %v469_v10 = vand.u32 2147483648, %v451_v0  ;;  %v467_v13 = vand.u32 2147483647, %v451_v0  ;;  %vm463_vm5 = vweird.f32 %v451_v0 }
 0x232   :  { %v415_v1 = vpop.f32.mrf.mxu2  ;;  %v470_v17 = vor.u32 1.1754944e-38, %v469_v10  ;;  %vm468_vm7 = vcmp.eq.f32.partialorder %v467_v13, 8.507059e+37 }
 0x233   :  { %v954_v2 = vadd.f32 %v949_v56, %v415_v1 }
 0x235   :  { %v700_v3 = vpop.eup %699  ;;  %v620_v4 = vmul.f32 -1.442695, %v954_v2 }
 0x236   :  { %v702_v6 = vpop.eup %701  ;;  %v452_v7 = vadd.f32 1.0, %v700_v3 }
 0x237   :  { %v459_v8 = vmul.f32 %v702_v6, %v451_v0  ;;  %703 = vpow2.f32 %v620_v4  ;;  %vm464_vm4 = vweird.f32 %v702_v6 }
 0x238   :  { %705 = vrcp.f32 %v452_v7  ;;  %vm465_vm6 = vmor %vm463_vm5, %vm464_vm4  ;;  %v484_v27 = vand.u32 2147483648, %v452_v7  ;;  %v482_v30 = vand.u32 2147483647, %v452_v7  ;;  %vm478_vm9 = vweird.f32 %v452_v7 }
 0x239   :  { %v460_v9 = vsub.f32 1.0, %v459_v8 }
 0x23a   :  { %v418_v11 = vpop.f32.mrf.mxu2  ;;  %v485_v34 = vor.u32 1.1754944e-38, %v484_v27  ;;  %vm483_vm11 = vcmp.eq.f32.partialorder %v482_v30, 8.507059e+37 }
 0x23b   :  { %v461_v12 = vmul.f32 %v702_v6, %v460_v9  ;;  %v958_v14 = vadd.f32 %v949_v56, %v418_v11 }
 0x23d   :  { %v704_v15 = vpop.eup %703  ;;  %v462_v16 = vadd.f32 %v702_v6, %v461_v12  ;;  %v621_v18 = vmul.f32 -1.442695, %v958_v14 }
 0x23e   :  { %v706_v19 = vpop.eup %705  ;;  %v453_v20 = vadd.f32 1.0, %v704_v15 }
 0x23f   :  { %v466_v21 = vsel %vm465_vm6, %v702_v6, %v462_v16  ;;  %v474_v22 = vmul.f32 %v706_v19, %v452_v7  ;;  %707 = vpow2.f32 %v621_v18  ;;  %vm479_vm8 = vweird.f32 %v706_v19 }
 0x240   :  { %v471_v23 = vsel %vm468_vm7, %v470_v17, %v466_v21  ;;  %709 = vrcp.f32 %v453_v20  ;;  %vm480_vm10 = vmor %vm478_vm9, %vm479_vm8  ;;  %v499_v41 = vand.u32 2147483648, %v453_v20  ;;  %v497_v44 = vand.u32 2147483647, %v453_v20 }
 0x241   :  { %v563_v24 = vmul.f32 %v471_v23, %v410_v58  ;;  %v475_v25 = vsub.f32 1.0, %v474_v22  ;;  %vm493_vm13 = vweird.f32 %v453_v20 }
 0x242   :  { %v421_v28 = vpop.f32.mrf.mxu2  ;;  %v500_v47 = vor.u32 1.1754944e-38, %v499_v41  ;;  %vm498_vm15 = vcmp.eq.f32.partialorder %v497_v44, 8.507059e+37 }
 0x243   :  { %570 = vst [vmem:[#allocation7] sm:$0xff] %v563_v24  ;;  %v476_v29 = vmul.f32 %v706_v19, %v475_v25  ;;  %v962_v31 = vadd.f32 %v949_v56, %v421_v28 }
 0x245   :  { %v708_v5 = vpop.eup %707  ;;  %v477_v26 = vadd.f32 %v706_v19, %v476_v29  ;;  %v622_v32 = vmul.f32 -1.442695, %v962_v31 }
 0x246   :  { %v710_v33 = vpop.eup %709  ;;  %v454_v35 = vadd.f32 1.0, %v708_v5 }
 0x247   :  { %v481_v36 = vsel %vm480_vm10, %v706_v19, %v477_v26  ;;  %v489_v37 = vmul.f32 %v710_v33, %v453_v20  ;;  %711 = vpow2.f32 %v622_v32  ;;  %vm494_vm12 = vweird.f32 %v710_v33 }
 0x248   :  { %v486_v38 = vsel %vm483_vm11, %v485_v34, %v481_v36  ;;  %713 = vrcp.f32 %v454_v35  ;;  %vm495_vm14 = vmor %vm493_vm13, %vm494_vm12  ;;  %v514_v57 = vand.u32 2147483648, %v454_v35  ;;  %v512_v59 = vand.u32 2147483647, %v454_v35 }
 0x249   :  { %v564_v39 = vmul.f32 %v486_v38, %v413_v61  ;;  %v490_v40 = vsub.f32 1.0, %v489_v37  ;;  %vm508_vm1 = vweird.f32 %v454_v35 }
 0x24a   :  { %v515_v63 = vor.u32 1.1754944e-38, %v514_v57  ;;  %vm513_vm3 = vcmp.eq.f32.partialorder %v512_v59, 8.507059e+37 }
 0x24b   :  { %571 = vst [vmem:[#allocation7 + $0x8] sm:$0xff] %v564_v39  ;;  %v491_v43 = vmul.f32 %v710_v33, %v490_v40 }
 0x24d   :  { %v712_v45 = vpop.eup %711  ;;  %v492_v42 = vadd.f32 %v710_v33, %v491_v43 }
 0x24e   :  { %v714_v46 = vpop.eup %713  ;;  %v455_v48 = vadd.f32 1.0, %v712_v45 }
 0x24f   :  { %v496_v49 = vsel %vm495_vm14, %v710_v33, %v492_v42  ;;  %v504_v50 = vmul.f32 %v714_v46, %v454_v35  ;;  %vm509_vm0 = vweird.f32 %v714_v46 }
 0x250   :  { %v501_v51 = vsel %vm498_vm15, %v500_v47, %v496_v49  ;;  %715 = vrcp.f32 %v455_v48  ;;  %v424_v52 = vpop.f32.mrf.mxu2  ;;  %vm510_vm2 = vmor %vm508_vm1, %vm509_vm0  ;;  %v529_v8 = vand.u32 2147483648, %v455_v48  ;;  %v527_v11 = vand.u32 2147483647, %v455_v48 }
 0x251   :  { %v565_v53 = vmul.f32 %v501_v51, %v954_v2  ;;  %v505_v54 = vsub.f32 1.0, %v504_v50  ;;  %v425_v55 = vadd.f32 %v949_v56, %v424_v52  ;;  %vm523_vm5 = vweird.f32 %v455_v48 }
 0x252   :  { %v530_v16 = vor.u32 1.1754944e-38, %v529_v8  ;;  %vm528_vm7 = vcmp.eq.f32.partialorder %v527_v11, 8.507059e+37 }
 0x253   :  { %572 = vst [vmem:[#allocation7 + $0x10] sm:$0xff] %v565_v53  ;;  %v506_v58 = vmul.f32 %v714_v46, %v505_v54  ;;  %v623_v60 = vmul.f32 -1.442695, %v425_v55 }
 0x255   :  { %v507_v61 = vadd.f32 %v714_v46, %v506_v58  ;;  %717 = vpow2.f32 %v623_v60 }
 0x256   :  { %v716_v62 = vpop.eup %715 }
 0x257   :  { %v511_v0 = vsel %vm510_vm2, %v714_v46, %v507_v61  ;;  %v519_v1 = vmul.f32 %v716_v62, %v455_v48  ;;  %vm524_vm4 = vweird.f32 %v716_v62 }
 0x258   :  { %v516_v3 = vsel %vm513_vm3, %v515_v63, %v511_v0  ;;  %v427_v2 = vpop.f32.mrf.mxu3  ;;  %vm525_vm6 = vmor %vm523_vm5, %vm524_vm4 }
 0x259   :  { %v566_v4 = vmul.f32 %v516_v3, %v958_v14  ;;  %v520_v6 = vsub.f32 1.0, %v519_v1  ;;  %v428_v7 = vadd.f32 %v949_v56, %v427_v2 }
 0x25b   :  { %v718_v9 = vpop.eup %717  ;;  %573 = vst [vmem:[#allocation7 + $0x18] sm:$0xff] %v566_v4  ;;  %v521_v10 = vmul.f32 %v716_v62, %v520_v6  ;;  %v624_v12 = vmul.f32 -1.442695, %v428_v7 }
 0x25c   :  { %v456_v13 = vadd.f32 1.0, %v718_v9 }
 0x25d   :  { %v522_v15 = vadd.f32 %v716_v62, %v521_v10  ;;  %719 = vpow2.f32 %v624_v12 }
 0x25e   :  { %721 = vrcp.f32 %v456_v13  ;;  %v544_v23 = vand.u32 2147483648, %v456_v13  ;;  %v542_v25 = vand.u32 2147483647, %v456_v13  ;;  %vm538_vm9 = vweird.f32 %v456_v13 }
 0x25f   :  { %v526_v18 = vsel %vm525_vm6, %v716_v62, %v522_v15 }
 0x260   :  { %v531_v14 = vsel %vm528_vm7, %v530_v16, %v526_v18  ;;  %v545_v29 = vor.u32 1.1754944e-38, %v544_v23  ;;  %vm543_vm11 = vcmp.eq.f32.partialorder %v542_v25, 8.507059e+37 }
 0x261   :  { %v567_v19 = vmul.f32 %v531_v14, %v962_v31 }
 0x263   :  { %v720_v56 = vpop.eup %719  ;;  %574 = vst [vmem:[#allocation7 + $0x20] sm:$0xff] %v567_v19 }
 0x264   :  { %v722_v17 = vpop.eup %721  ;;  %v457_v20 = vadd.f32 1.0, %v720_v56 }
 0x265   :  { %v534_v21 = vmul.f32 %v722_v17, %v456_v13  ;;  %vm539_vm8 = vweird.f32 %v722_v17 }
 0x266   :  { %723 = vrcp.f32 %v457_v20  ;;  %vm540_vm10 = vmor %vm538_vm9, %vm539_vm8  ;;  %v559_v33 = vand.u32 2147483648, %v457_v20  ;;  %v557_v35 = vand.u32 2147483647, %v457_v20  ;;  %vm553_vm13 = vweird.f32 %v457_v20 }
 0x267   :  { %v535_v22 = vsub.f32 1.0, %v534_v21 }
 0x268   :  { %v560_v37 = vor.u32 1.1754944e-38, %v559_v33  ;;  %vm558_vm15 = vcmp.eq.f32.partialorder %v557_v35, 8.507059e+37 }
 0x269   :  { %v536_v24 = vmul.f32 %v722_v17, %v535_v22 }
 0x26b   :  { %v537_v27 = vadd.f32 %v722_v17, %v536_v24 }
 0x26c   :  { %v724_v28 = vpop.eup %723 }
 0x26d   :  { %v541_v30 = vsel %vm540_vm10, %v722_v17, %v537_v27  ;;  %v549_v5 = vmul.f32 %v724_v28, %v457_v20  ;;  %vm554_vm12 = vweird.f32 %v724_v28 }
 0x26e   :  { %v546_v31 = vsel %vm543_vm11, %v545_v29, %v541_v30  ;;  %vm555_vm14 = vmor %vm553_vm13, %vm554_vm12 }
 0x26f   :  { %v568_v26 = vmul.f32 %v546_v31, %v425_v55  ;;  %v550_v32 = vsub.f32 1.0, %v549_v5 }
 0x271   :  { %575 = vst [vmem:[#allocation7 + $0x28] sm:$0xff] %v568_v26  ;;  %v551_v34 = vmul.f32 %v724_v28, %v550_v32 }
 0x273   :  { %v552_v36 = vadd.f32 %v724_v28, %v551_v34 }
 0x275   :  { %v556_v38 = vsel %vm555_vm14, %v724_v28, %v552_v36 }
 0x276   :  { %v561_v39 = vsel %vm558_vm15, %v560_v37, %v556_v38 }
 0x277   :  { %v569_v40 = vmul.f32 %v561_v39, %v428_v7 }
 0x279   :  { %576 = vst [vmem:[#allocation7 + $0x30] sm:$0xff] %v569_v40 }
 0x27a   :  { %589 = dma.vmem_to_hbm [thread:$0]  %s582_s12, 896, %s584_s15, [#allocation4], %s804_s29, %s804_s29, %s805_s30  }
 0x27b   :  { %801 = dma.done.wait [#allocation4], 896  }
 0x27c   :  { %802 = vsyncadd [#allocation4], 4294966400 }
 0x27d   :  { %594 = vsyncpa [#allocation3], 1 }
 0x27e   :  { %595 = vsyncpa [#allocation6], 1 }
 0x27f   :  { %596 = vsyncpa [#allocation4], 1 }

</bundles_post_ra>
